<compile_context>
chip_gen: v6e
topology: v6e:2x2x1
jax: 0.10.0
libtpu: 0.0.40
codegen_flags: <defaults>
</compile_context>

<pallas_src>
import jax
import jax.numpy as jnp
from jax.experimental import pallas as pl
from jax.experimental.pallas import tpu as pltpu


def _round_up(x, m):
    return ((x + m - 1) // m) * m


def _cdiv(a, b):
    return -(-a // b)


def _vmem_budget_bytes():
    """Per-generation VMEM budget for this call (scoped limit)."""
    cap = 64 * 1024 * 1024                      # safe lower bound (v7x per-TC)
    try:
        info = pltpu.get_tpu_info()
        cap = int(getattr(info, "vmem_capacity_bytes", cap))
    except Exception:
        pass
    # <= ~48 MiB on 64-MiB chips (v7x), up to 96 MiB on 128-MiB chips (v5e/v6e).
    return min(3 * cap // 4, 96 * 1024 * 1024)


def _pick_tiling(B, d_in, Hp, Cp, vmem_budget):
    """Batch tile TB, padded batch Bp and tile count, sized to the VMEM budget.

    Keeps over-padding < 8 rows per tile and guarantees >= 2 grid steps when
    the batch allows, so v7x's second TensorCore gets work on the "parallel"
    batch axis (neutral on single-TC v5e/v6e).
    """
    b8 = _round_up(max(B, 1), 8)
    # Resident operand bytes per buffer (weights bf16, biases f32).
    weight_bytes = d_in * Hp * 2 + Hp * Cp * 2 + (Hp + Cp) * 4
    # Per-batch-row VMEM bytes: x (2 buffers, f32), out (2 buffers, f32),
    # plus the in-kernel f32 hidden / logits temporaries.
    per_row = 2 * d_in * 4 + 2 * Cp * 4 + Hp * 4 + Cp * 4
    usable = (3 * vmem_budget) // 4
    # Count weights twice so the tile still fits if the single-buffer request
    # is rejected and the fallback double-buffers them.
    avail = max(usable - 2 * weight_bytes, per_row * 8)
    tb_cap = max(8, min(1024, (avail // per_row) // 8 * 8))

    n_tiles = _cdiv(b8, tb_cap)
    if b8 >= 16:
        n_tiles = max(n_tiles, 2)               # megacore-aware grid on v7x
    tb = _round_up(_cdiv(b8, n_tiles), 8)
    return tb, tb * n_tiles, n_tiles


def _mlp_kernel(x_ref, w1_ref, b1_ref, w2_ref, b2_ref, o_ref):
    # x arrives in its original f32 / unpadded-K form; cast to bf16 in-kernel
    # (avoids a separate HBM pad/cast copy before every launch).
    x = x_ref[...].astype(jnp.bfloat16)
    # hidden = relu(x @ W1 + b1): bf16 MXU operands, f32 accumulation.
    h = jnp.dot(x, w1_ref[...], preferred_element_type=jnp.float32)
    h = jnp.maximum(h + b1_ref[...], 0.0)
    # logits = hidden @ W2 + b2.  Hidden is re-quantized to bf16 for the MXU;
    # error grows with hidden width (fine at these sizes, revisit for large H).
    out = jnp.dot(h.astype(jnp.bfloat16), w2_ref[...],
                  preferred_element_type=jnp.float32)
    o_ref[...] = out + b2_ref[...]              # lane-dense f32 store (Cp % 128 == 0)


def _launch(xp, w1p, b1p, w2p, b2p, *, TB, vmem_limit, flops, bytes_accessed,
            single_buffer_weights):
    Bp, d_in = xp.shape
    Hp = w1p.shape[1]
    Cp = w2p.shape[1]

    def _resident(shape):
        # Constant index_map -> the block never changes; one buffer suffices.
        if single_buffer_weights:
            return pl.BlockSpec(shape, lambda i: (0, 0),
                                pipeline_mode=pl.Buffered(1))
        return pl.BlockSpec(shape, lambda i: (0, 0))

    return pl.pallas_call(
        _mlp_kernel,
        out_shape=jax.ShapeDtypeStruct((Bp, Cp), jnp.float32),
        grid_spec=pltpu.PrefetchScalarGridSpec(
            num_scalar_prefetch=0,
            grid=(Bp // TB,),
            in_specs=[
                # x: streamed batch tiles, default double-buffering.
                # (Bump to pl.Buffered(3) only if a profile shows the x DMA exposed.)
                pl.BlockSpec((TB, d_in), lambda i: (i, 0)),
                _resident((d_in, Hp)),          # W1: VMEM-resident
                _resident((1, Hp)),             # b1: VMEM-resident
                _resident((Hp, Cp)),            # W2: VMEM-resident
                _resident((1, Cp)),             # b2: VMEM-resident
            ],
            out_specs=pl.BlockSpec((TB, Cp), lambda i: (i, 0)),
        ),
        compiler_params=pltpu.CompilerParams(
            dimension_semantics=("parallel",),  # shard batch tiles across TCs (v7x)
            vmem_limit_bytes=vmem_limit,
        ),
        cost_estimate=pl.CostEstimate(
            flops=flops, transcendentals=0, bytes_accessed=bytes_accessed),
    )(xp, w1p, b1p, w2p, b2p)


def mlp_forward(x, w1p, b1p, w2p, b2p, n_classes):
    """relu(x @ w1 + b1) @ w2 + b2 with lane-padded weights.

    x: (B, d_in) f32 (unpadded).  w1p: (d_in, Hp) bf16, w2p: (Hp, Cp) bf16,
    b1p: (1, Hp) f32, b2p: (1, Cp) f32, with Hp/Cp multiples of 128.
    Returns (B, n_classes) f32.
    """
    B, d_in = x.shape
    Hp = w1p.shape[1]
    Cp = w2p.shape[1]

    budget = _vmem_budget_bytes()
    TB, Bp, _ = _pick_tiling(B, d_in, Hp, Cp, budget)
    # TODO(synk): when w1p+w2p exceed the resident-weight VMEM budget (v7x 64 MiB),
    # add a K grid axis ("arbitrary") over d_in tiles with a VMEM f32 accumulator
    # instead of keeping W1 fully resident.

    # Pad only the batch axis, and only when needed (single fused jnp.pad; the
    # feature axis stays unpadded -> no per-call x copy in HBM).  Padded rows
    # produce garbage that is sliced off below; rows are independent.
    xp = x if Bp == B else jnp.pad(x, ((0, Bp - B), (0, 0)))

    flops = 2 * Bp * (d_in * Hp + Hp * Cp)
    bytes_accessed = (xp.size * 4 + w1p.size * 2 + w2p.size * 2
                      + b1p.size * 4 + b2p.size * 4 + Bp * Cp * 4)
    kwargs = dict(TB=TB, vmem_limit=budget, flops=flops,
                  bytes_accessed=bytes_accessed)

    try:
        out_p = _launch(xp, w1p, b1p, w2p, b2p,
                        single_buffer_weights=True, **kwargs)
        out_p = jax.block_until_ready(out_p)
    except Exception:
        # pipeline_mode=pl.Buffered(1) not supported by this jax build; fall
        # back to the (verified) default double-buffered resident specs.
        out_p = _launch(xp, w1p, b1p, w2p, b2p,
                        single_buffer_weights=False, **kwargs)

    return out_p[:B, :n_classes]


class InnerClassifier:
    """Representative wrapped model (Linear -> ReLU -> Linear).

    Output dims are zero-padded ONCE at construction to lane-dense shapes
    (multiples of 128) and weights are stored in bf16 for the MXU; biases stay
    f32 for the f32 bias-add/ReLU path.  The contraction dim of W1 stays
    unpadded (full-extent blocks are legal), so x needs no per-call pad.
    """
    # Note: on v6e/v7x, padding hidden to multiples of 256 (2x256x256 MXU) can
    # help once hidden >= 256; kept at 128 here (hidden is tiny).
    # Note: fp8 (e4m3) weights would halve DMA/VMEM on v7x only; kept bf16.

    def __init__(self, key, d_in, hidden, n_classes):
        k1, k2 = jax.random.split(key)
        scale1 = 1.0 / jnp.sqrt(jnp.float32(d_in))
        scale2 = 1.0 / jnp.sqrt(jnp.float32(hidden))
        w1 = jax.random.normal(k1, (d_in, hidden), jnp.float32) * scale1
        b1 = jnp.zeros((hidden,), jnp.float32)
        w2 = jax.random.normal(k2, (hidden, n_classes), jnp.float32) * scale2
        b2 = jnp.zeros((n_classes,), jnp.float32)

        self.d_in, self.hidden, self.n_classes = d_in, hidden, n_classes
        hp = _round_up(hidden, 128)
        cp = _round_up(n_classes, 128)

        self.w1p = jnp.zeros((d_in, hp), jnp.bfloat16).at[:, :hidden].set(
            w1.astype(jnp.bfloat16))
        self.b1p = jnp.zeros((1, hp), jnp.float32).at[0, :hidden].set(b1)
        self.w2p = jnp.zeros((hp, cp), jnp.bfloat16).at[:hidden, :n_classes].set(
            w2.astype(jnp.bfloat16))
        self.b2p = jnp.zeros((1, cp), jnp.float32).at[0, :n_classes].set(b2)

    def __call__(self, x):
        return mlp_forward(x, self.w1p, self.b1p, self.w2p, self.b2p,
                           self.n_classes)


class _DDP:
    """Stand-in for torch DDP: forward is a pure pass-through to `.module`.
    Gradient bucketing / all-reduce is training-only, not part of forward."""

    def __init__(self, module):
        self.module = module

    def __call__(self, *inputs, **kwargs):
        return self.module(*inputs, **kwargs)


class DistributedFinalModel:
    """JAX/Pallas equivalent of the PyTorch DistributedFinalModel wrapper:
    forward delegates to the DDP-wrapped model; unknown attributes fall
    through to the underlying module."""

    def __init__(self, model):
        self.model = _DDP(model)

    def __call__(self, *inputs, **kwargs):
        return self.model(*inputs, **kwargs)

    def __getattr__(self, name):
        # Only called when normal lookup fails -> delegate to wrapped module.
        return getattr(self.__dict__["model"].module, name)


if __name__ == "__main__":
    key = jax.random.PRNGKey(0)
    k_x, k_p = jax.random.split(key)

    B, D_IN, HIDDEN, N_CLASSES = 8, 32, 32, 8
    x = jax.random.normal(k_x, (B, D_IN), jnp.float32)

    inner = InnerClassifier(k_p, D_IN, HIDDEN, N_CLASSES)
    wrapped = DistributedFinalModel(inner)

    out = wrapped(x)
    jax.block_until_ready(out)
    assert out.shape == (B, N_CLASSES)

    # wrapper output == inner-model output (pure delegation)
    ref_inner = inner(x)
    jax.block_until_ready(ref_inner)
    assert bool(jnp.allclose(out, ref_inner))

    # numerics vs a pure-JAX f32 reference built from the same bf16 weights
    w1 = inner.w1p[:, :HIDDEN].astype(jnp.float32)
    b1 = inner.b1p[0, :HIDDEN]
    w2 = inner.w2p[:HIDDEN, :N_CLASSES].astype(jnp.float32)
    b2 = inner.b2p[0, :N_CLASSES]
    ref = jnp.maximum(x @ w1 + b1, 0.0) @ w2 + b2
    assert bool(jnp.allclose(out, ref, atol=2e-2, rtol=2e-2))

    # __getattr__ fall-through through the DDP stand-in
    assert wrapped.n_classes == N_CLASSES

    print("KERNEL_OK")
</pallas_src>

<mosaic_0001>
module attributes {stable_mosaic.version = 11 : i64} {
  func.func @_mlp_kernel(%arg0: i32, %arg1: memref<8x32xf32, #tpu.memory_space<vmem>>, %arg2: memref<32x128xbf16, #tpu.memory_space<vmem>>, %arg3: memref<1x128xf32, #tpu.memory_space<vmem>>, %arg4: memref<128x128xbf16, #tpu.memory_space<vmem>>, %arg5: memref<1x128xf32, #tpu.memory_space<vmem>>, %arg6: memref<8x128xf32, #tpu.memory_space<vmem>>) attributes {dimension_semantics = [#tpu.dimension_semantics<parallel>], iteration_bounds = array<i64: 1>, scalar_prefetch = 0 : i64, scratch_operands = 0 : i64, tpu.core_type = #tpu.core_type<tc>, window_params = [{transform_indices = @transform_0, window_bounds = array<i64: 8, 32>}, {pipeline_mode = #tpu.pipeline_mode<synchronous>, transform_indices = @transform_1, window_bounds = array<i64: 32, 128>}, {pipeline_mode = #tpu.pipeline_mode<synchronous>, transform_indices = @transform_2, window_bounds = array<i64: 1, 128>}, {pipeline_mode = #tpu.pipeline_mode<synchronous>, transform_indices = @transform_3, window_bounds = array<i64: 128, 128>}, {pipeline_mode = #tpu.pipeline_mode<synchronous>, transform_indices = @transform_4, window_bounds = array<i64: 1, 128>}, {transform_indices = @transform_5, window_bounds = array<i64: 8, 128>}]} {
    %c0 = arith.constant 0 : index
    %c0_0 = arith.constant 0 : index
    %0 = vector.load %arg1[%c0, %c0_0] : memref<8x32xf32, #tpu.memory_space<vmem>>, vector<8x32xf32>
    %1 = arith.truncf %0 : vector<8x32xf32> to vector<8x32xbf16>
    %c0_1 = arith.constant 0 : index
    %c0_2 = arith.constant 0 : index
    %2 = vector.load %arg2[%c0_1, %c0_2] : memref<32x128xbf16, #tpu.memory_space<vmem>>, vector<32x128xbf16>
    %cst = arith.constant dense<0.000000e+00> : vector<8x128xf32>
    %3 = tpu.matmul %1, %2, %cst {dimension_numbers = #tpu.dot_dimension_numbers<[1], [0], [0], [1], [0, 0, 1, 1], [], []>} : vector<8x32xbf16>, vector<32x128xbf16>, vector<8x128xf32> -> vector<8x128xf32>
    %c0_3 = arith.constant 0 : index
    %c0_4 = arith.constant 0 : index
    %4 = vector.load %arg3[%c0_3, %c0_4] : memref<1x128xf32, #tpu.memory_space<vmem>>, vector<1x128xf32>
    %5 = vector.broadcast %4 : vector<1x128xf32> to vector<8x128xf32>
    %6 = arith.addf %3, %5 : vector<8x128xf32>
    %cst_5 = arith.constant 0.000000e+00 : f32
    %7 = vector.broadcast %cst_5 : f32 to vector<8x128xf32>
    %8 = arith.maximumf %6, %7 : vector<8x128xf32>
    %9 = arith.truncf %8 : vector<8x128xf32> to vector<8x128xbf16>
    %c0_6 = arith.constant 0 : index
    %c0_7 = arith.constant 0 : index
    %10 = vector.load %arg4[%c0_6, %c0_7] : memref<128x128xbf16, #tpu.memory_space<vmem>>, vector<128x128xbf16>
    %cst_8 = arith.constant dense<0.000000e+00> : vector<8x128xf32>
    %11 = tpu.matmul %9, %10, %cst_8 {dimension_numbers = #tpu.dot_dimension_numbers<[1], [0], [0], [1], [0, 0, 1, 1], [], []>} : vector<8x128xbf16>, vector<128x128xbf16>, vector<8x128xf32> -> vector<8x128xf32>
    %c0_9 = arith.constant 0 : index
    %c0_10 = arith.constant 0 : index
    %12 = vector.load %arg5[%c0_9, %c0_10] : memref<1x128xf32, #tpu.memory_space<vmem>>, vector<1x128xf32>
    %13 = vector.broadcast %12 : vector<1x128xf32> to vector<8x128xf32>
    %14 = arith.addf %11, %13 : vector<8x128xf32>
    %c0_11 = arith.constant 0 : index
    %c0_12 = arith.constant 0 : index
    %15 = vector.load %arg6[%c0_11, %c0_12] : memref<8x128xf32, #tpu.memory_space<vmem>>, vector<8x128xf32>
    tpu.vector_store %arg6[%c0_11, %c0_12], %14 {strides = array<i32>} : memref<8x128xf32, #tpu.memory_space<vmem>>, vector<8x128xf32>,
    return
  }
  func.func @transform_0(%arg0: i32) -> (i32, i32) {
    %c0_i32 = arith.constant 0 : i32
    %c0_i32_0 = arith.constant 0 : i32
    return %arg0, %c0_i32 : i32, i32
  }
  func.func @transform_1(%arg0: i32) -> (i32, i32) {
    %c0_i32 = arith.constant 0 : i32
    %c0_i32_0 = arith.constant 0 : i32
    %c0_i32_1 = arith.constant 0 : i32
    return %c0_i32, %c0_i32_0 : i32, i32
  }
  func.func @transform_2(%arg0: i32) -> (i32, i32) {
    %c0_i32 = arith.constant 0 : i32
    %c0_i32_0 = arith.constant 0 : i32
    %c0_i32_1 = arith.constant 0 : i32
    return %c0_i32, %c0_i32_0 : i32, i32
  }
  func.func @transform_3(%arg0: i32) -> (i32, i32) {
    %c0_i32 = arith.constant 0 : i32
    %c0_i32_0 = arith.constant 0 : i32
    %c0_i32_1 = arith.constant 0 : i32
    return %c0_i32, %c0_i32_0 : i32, i32
  }
  func.func @transform_4(%arg0: i32) -> (i32, i32) {
    %c0_i32 = arith.constant 0 : i32
    %c0_i32_0 = arith.constant 0 : i32
    %c0_i32_1 = arith.constant 0 : i32
    return %c0_i32, %c0_i32_0 : i32, i32
  }
  func.func @transform_5(%arg0: i32) -> (i32, i32) {
    %c0_i32 = arith.constant 0 : i32
    %c0_i32_0 = arith.constant 0 : i32
    return %arg0, %c0_i32 : i32, i32
  }
}

module attributes {stable_mosaic.version = 11 : i64} {
  func.func @_mlp_kernel(%arg0: i32, %arg1: memref<8x32xf32, #tpu.memory_space<vmem>>, %arg2: memref<32x128xbf16, #tpu.memory_space<vmem>>, %arg3: memref<1x128xf32, #tpu.memory_space<vmem>>, %arg4: memref<128x128xbf16, #tpu.memory_space<vmem>>, %arg5: memref<1x128xf32, #tpu.memory_space<vmem>>, %arg6: memref<8x128xf32, #tpu.memory_space<vmem>>) attributes {dimension_semantics = [#tpu.dimension_semantics<parallel>], iteration_bounds = array<i64: 1>, scalar_prefetch = 0 : i64, scratch_operands = 0 : i64, tpu.core_type = #tpu.core_type<tc>, window_params = [{transform_indices = @transform_0, window_bounds = array<i64: 8, 32>}, {pipeline_mode = #tpu.pipeline_mode<synchronous>, transform_indices = @transform_1, window_bounds = array<i64: 32, 128>}, {pipeline_mode = #tpu.pipeline_mode<synchronous>, transform_indices = @transform_2, window_bounds = array<i64: 1, 128>}, {pipeline_mode = #tpu.pipeline_mode<synchronous>, transform_indices = @transform_3, window_bounds = array<i64: 128, 128>}, {pipeline_mode = #tpu.pipeline_mode<synchronous>, transform_indices = @transform_4, window_bounds = array<i64: 1, 128>}, {transform_indices = @transform_5, window_bounds = array<i64: 8, 128>}]} {
    %c0 = arith.constant 0 : index
    %c0_0 = arith.constant 0 : index
    %0 = vector.load %arg1[%c0, %c0_0] : memref<8x32xf32, #tpu.memory_space<vmem>>, vector<8x32xf32>
    %1 = arith.truncf %0 : vector<8x32xf32> to vector<8x32xbf16>
    %c0_1 = arith.constant 0 : index
    %c0_2 = arith.constant 0 : index
    %2 = vector.load %arg2[%c0_1, %c0_2] : memref<32x128xbf16, #tpu.memory_space<vmem>>, vector<32x128xbf16>
    %cst = arith.constant dense<0.000000e+00> : vector<8x128xf32>
    %3 = tpu.matmul %1, %2, %cst {dimension_numbers = #tpu.dot_dimension_numbers<[1], [0], [0], [1], [0, 0, 1, 1], [], []>} : vector<8x32xbf16>, vector<32x128xbf16>, vector<8x128xf32> -> vector<8x128xf32>
    %c0_3 = arith.constant 0 : index
    %c0_4 = arith.constant 0 : index
    %4 = vector.load %arg3[%c0_3, %c0_4] : memref<1x128xf32, #tpu.memory_space<vmem>>, vector<1x128xf32>
    %5 = vector.broadcast %4 : vector<1x128xf32> to vector<8x128xf32>
    %6 = arith.addf %3, %5 : vector<8x128xf32>
    %cst_5 = arith.constant 0.000000e+00 : f32
    %7 = vector.broadcast %cst_5 : f32 to vector<8x128xf32>
    %8 = arith.maximumf %6, %7 : vector<8x128xf32>
    %9 = arith.truncf %8 : vector<8x128xf32> to vector<8x128xbf16>
    %c0_6 = arith.constant 0 : index
    %c0_7 = arith.constant 0 : index
    %10 = vector.load %arg4[%c0_6, %c0_7] : memref<128x128xbf16, #tpu.memory_space<vmem>>, vector<128x128xbf16>
    %cst_8 = arith.constant dense<0.000000e+00> : vector<8x128xf32>
    %11 = tpu.matmul %9, %10, %cst_8 {dimension_numbers = #tpu.dot_dimension_numbers<[1], [0], [0], [1], [0, 0, 1, 1], [], []>} : vector<8x128xbf16>, vector<128x128xbf16>, vector<8x128xf32> -> vector<8x128xf32>
    %c0_9 = arith.constant 0 : index
    %c0_10 = arith.constant 0 : index
    %12 = vector.load %arg5[%c0_9, %c0_10] : memref<1x128xf32, #tpu.memory_space<vmem>>, vector<1x128xf32>
    %13 = vector.broadcast %12 : vector<1x128xf32> to vector<8x128xf32>
    %14 = arith.addf %11, %13 : vector<8x128xf32>
    %c0_11 = arith.constant 0 : index
    %c0_12 = arith.constant 0 : index
    %15 = vector.load %arg6[%c0_11, %c0_12] : memref<8x128xf32, #tpu.memory_space<vmem>>, vector<8x128xf32>
    tpu.vector_store %arg6[%c0_11, %c0_12], %14 {strides = array<i32>} : memref<8x128xf32, #tpu.memory_space<vmem>>, vector<8x128xf32>,
    return
  }
  func.func @transform_0(%arg0: i32) -> (i32, i32) {
    %c0_i32 = arith.constant 0 : i32
    %c0_i32_0 = arith.constant 0 : i32
    return %arg0, %c0_i32 : i32, i32
  }
  func.func @transform_1(%arg0: i32) -> (i32, i32) {
    %c0_i32 = arith.constant 0 : i32
    %c0_i32_0 = arith.constant 0 : i32
    %c0_i32_1 = arith.constant 0 : i32
    return %c0_i32, %c0_i32_0 : i32, i32
  }
  func.func @transform_2(%arg0: i32) -> (i32, i32) {
    %c0_i32 = arith.constant 0 : i32
    %c0_i32_0 = arith.constant 0 : i32
    %c0_i32_1 = arith.constant 0 : i32
    return %c0_i32, %c0_i32_0 : i32, i32
  }
  func.func @transform_3(%arg0: i32) -> (i32, i32) {
    %c0_i32 = arith.constant 0 : i32
    %c0_i32_0 = arith.constant 0 : i32
    %c0_i32_1 = arith.constant 0 : i32
    return %c0_i32, %c0_i32_0 : i32, i32
  }
  func.func @transform_4(%arg0: i32) -> (i32, i32) {
    %c0_i32 = arith.constant 0 : i32
    %c0_i32_0 = arith.constant 0 : i32
    %c0_i32_1 = arith.constant 0 : i32
    return %c0_i32, %c0_i32_0 : i32, i32
  }
  func.func @transform_5(%arg0: i32) -> (i32, i32) {
    %c0_i32 = arith.constant 0 : i32
    %c0_i32_0 = arith.constant 0 : i32
    return %arg0, %c0_i32 : i32, i32
  }
}

</mosaic_0001>

<bundles_post_ra>
// kernel: tpu_custom_call.1
= control target key start
LH: loop header
LB: loop body
LE: loop exit
PB: predicated region body
PF: predicated region fallthrough
CT: control target
= control target key end

     0   :  { %10 = vsyncpa [#allocation3], 0  ;;  %s473_s0 = inlined_call_operand.hbm [shape: f32[8,32], index: 0, kind: input, shape index: {}]   ;;  %s474_s1 = inlined_call_operand.hbm [shape: bf16[32,128], index: 1, kind: input, shape index: {}]   ;;  %s475_s2 = inlined_call_operand.vmem [shape: f32[1,128], index: 2, kind: input, shape index: {}]   ;;  %s476_s3 = inlined_call_operand.hbm [shape: bf16[128,128], index: 3, kind: input, shape index: {}]   ;;  %s477_s4 = inlined_call_operand.vmem [shape: f32[1,128], index: 4, kind: input, shape index: {}]   ;;  %s478_s5 = inlined_call_operand.hbm [shape: f32[8,128], index: 5, kind: output, shape index: {}]  }
   0x1   :  { %11 = vsyncpa [#allocation6], 0 }
   0x2   :  { %12 = vsyncpa [#allocation4], 0  ;;  %s417_s18 = smov [#allocation5]  }
   0x3   :  { %s28_s19 = sshll.u32 %s417_s18, 4  ;;  %s29_s19 = int_to_ptr.vmem [resolvable:$true] %s28_s19 }
   0x4   :  { %s339_s20 = scalar_lea.vmem %s29_s19, 256  ;;  %p344_p1 = scmp.lt.s32.totalorder %s29_s19, %s29_s19 }
   0x5   :  { %p340_p0 = scmp.ne.s32.totalorder %s29_s19, %s339_s20  ;;  %p345_p2 = scmp.lt.s32.totalorder %s339_s20, %s339_s20 }
   0x7   :  { %p346_p3 = por %p345_p2, %p344_p1 }
   0x9   :  { %p347_p4 = pnand %p346_p3, %p340_p0 }
   0xb   :  { %350 = shalt.err (!%p347_p4)
}
   0xc   :  { %s418_s21 = smov 64   ;;  %s419_s22 = smov 4  }
   0xd   :  { %34 = dma.hbm_to_vmem [thread:$0]  %s474_s1, 256, %s29_s19, [#allocation6], %s418_s21, %s418_s21, %s419_s22  }
   0xe   :  { %s420_s25 = smov [#allocation2]   ;;  %s421_s27 = smov [#allocation7]  }
   0xf   :  { %s19_s26 = sshll.u32 %s420_s25, 4  ;;  %s42_s28 = sshll.u32 %s421_s27, 4  ;;  %s20_s26 = int_to_ptr.vmem [resolvable:$true] %s19_s26  ;;  %s43_s28 = int_to_ptr.vmem [resolvable:$true] %s42_s28 }
  0x10   :  { %s359_s29 = scalar_lea.vmem %s20_s26, 128  ;;  %p364_p6 = scmp.lt.s32.totalorder %s20_s26, %s20_s26 }
  0x11   :  { %p360_p5 = scmp.ne.s32.totalorder %s20_s26, %s359_s29  ;;  %p365_p7 = scmp.lt.s32.totalorder %s359_s29, %s359_s29 }
  0x13   :  { %p366_p8 = por %p365_p7, %p364_p6 }
  0x15   :  { %p367_p9 = pnand %p366_p8, %p360_p5 }
  0x17   :  { %370 = shalt.err (!%p367_p9)
}
  0x18   :  { %22 = dma.hbm_to_vmem [thread:$0]  %s473_s0, 128, %s20_s26, [#allocation3]  }
  0x19   :  { %s379_s7 = scalar_lea.vmem %s43_s28, 1024  ;;  %p384_p11 = scmp.lt.s32.totalorder %s43_s28, %s43_s28 }
  0x1a   :  { %p380_p10 = scmp.ne.s32.totalorder %s43_s28, %s379_s7  ;;  %p385_p12 = scmp.lt.s32.totalorder %s379_s7, %s379_s7 }
  0x1c   :  { %p386_p13 = por %p385_p12, %p384_p11 }
  0x1e   :  { %p387_p0 = pnand %p386_p13, %p380_p10 }
  0x20   :  { %390 = shalt.err (!%p387_p0)
}
  0x21   :  { %48 = dma.hbm_to_vmem [thread:$0]  %s476_s3, 1024, %s43_s28, [#allocation6], %s418_s21, %s418_s21, %s419_s22  }
  0x22   :  { %411 = dma.done.wait [#allocation3], 128  }
  0x23   :  { %412 = vsyncadd [#allocation3], 4294967168 }
  0x24   :  { %413 = dma.done.wait [#allocation6], 1280  }
  0x25   :  { %414 = vsyncadd [#allocation6], 4294966016  ;;  %v422_v0 = vmov 0.0   ;;  %vm423_vm0 = vmmov 0   ;;  %v321_v1 = vld [vmem:[#allocation5 + $0x8] sm:$0xff]   ;;  %v322_v2 = vld [vmem:[#allocation5] sm:$0xff]  }
  0x26   :  { %285 = vmatprep.subr.bf16.mxu0 %v422_v0  ;;  %289 = vmatprep.mubr.msk.bf16.mxu0 %vm423_vm0, %v422_v0  ;;  %v61_v3 = vld [vmem:[#allocation2] sm:$0xff]  ;;  %v323_v4 = vld [vmem:[#allocation7 + $0x38] sm:$0xff]   ;;  %v324_v6 = vld [vmem:[#allocation7 + $0x30] sm:$0xff]   ;;  %vm86_vm1 = vcmask 261120   ;;  %s424_s11 = smov [#allocation8]  }
  0x27   :  { %293 = vmatprep.subr.bf16.mxu1 %v422_v0  ;;  %309 = vmatprep.mubr.msk.bf16.mxu1 %vm423_vm0, %v422_v0  ;;  %v62_v5 = vpack.c.bf16 %v61_v3, %v61_v3  ;;  %v325_v7 = vld [vmem:[#allocation7 + $0x28] sm:$0xff]   ;;  %v326_v8 = vld [vmem:[#allocation7 + $0x20] sm:$0xff]   ;;  %v327_v9 = vld [vmem:[#allocation7 + $0x18] sm:$0xff]   ;;  %s250_s12 = sshll.u32 %s424_s11, 4  ;;  %s251_s12 = int_to_ptr.vmem [resolvable:$true] %s250_s12 }
  0x28   :  { %286 = vmatpush3.bf16.msra.mxu0 %v321_v1  ;;  %294 = vmatpush3.bf16.msra.mxu1 %v323_v4  ;;  %v328_v10 = vld [vmem:[#allocation7 + $0x10] sm:$0xff]   ;;  %v329_v11 = vld [vmem:[#allocation7 + $0x8] sm:$0xff]   ;;  %v330_v12 = vld [vmem:[#allocation7] sm:$0xff]   ;;  %p396_p2 = scmp.lt.s32.totalorder %s251_s12, %s251_s12 }
  0x29   :  { %287 = vmatprep.subr.bf16.mxu0 %v422_v0  ;;  %295 = vmatprep.subr.bf16.mxu1 %v422_v0  ;;  %v260_v13 = vld [vmem:[%s475_s2] ss:$0 sm:$0xff]  ;;  %s391_s2 = scalar_lea.vmem %s251_s12, 128 }
  0x2a   :  { %v264_v21 = vld [vmem:[%s477_s4] ss:$0 sm:$0xff]  ;;  %p392_p1 = scmp.ne.s32.totalorder %s251_s12, %s391_s2  ;;  %p397_p3 = scmp.lt.s32.totalorder %s391_s2, %s391_s2 }
  0x2c   :  { %288 = vmatpush3.bf16.msra.mxu0 %v322_v2  ;;  %296 = vmatpush3.bf16.msra.mxu1 %v324_v6  ;;  %p398_p4 = por %p397_p3, %p396_p2 }
  0x2d   :  { %297 = vmatprep.subr.bf16.mxu1 %v422_v0 }
  0x2e   :  { %p399_p5 = pnand %p398_p4, %p392_p1 }
  0x2f   :  { %290 = vmatmul.mubr.msk.bf16.vlgmr.msra.gmra.mxu0 %vm86_vm1, %v62_v5 }
  0x30   :  { %298 = vmatpush3.bf16.msra.mxu1 %v325_v7 }
  0x31   :  { %299 = vmatprep.subr.bf16.mxu1 %v422_v0 }
  0x34   :  { %300 = vmatpush3.bf16.msra.mxu1 %v326_v8 }
  0x35   :  { %301 = vmatprep.subr.bf16.mxu1 %v422_v0 }
  0x38   :  { %302 = vmatpush3.bf16.msra.mxu1 %v327_v9 }
  0x39   :  { %303 = vmatprep.subr.bf16.mxu1 %v422_v0 }
  0x3c   :  { %304 = vmatpush3.bf16.msra.mxu1 %v328_v10 }
  0x3d   :  { %305 = vmatprep.subr.bf16.mxu1 %v422_v0 }
  0x40   :  { %306 = vmatpush3.bf16.msra.mxu1 %v329_v11 }
  0x41   :  { %307 = vmatprep.subr.bf16.mxu1 %v422_v0 }
  0x44   :  { %308 = vmatpush3.bf16.msra.mxu1 %v330_v12 }
  0xef   :  { %v124_v14 = vpop.f32.mrf.mxu0 }
  0xf0   :  { %v125_v15 = vadd.f32 %v260_v13, %v124_v14 }
  0xf1   :  { %v291_v16 = vpop.f32.mrf.mxu0 }
  0xf2   :  { %v130_v17 = vmax.f32 %v125_v15, 0.0 }
  0xf3   :  { %v127_v18 = vpop.f32.mrf.mxu0 }
  0xf4   :  { %v131_v19 = vpack.c.bf16 %v130_v17, %v130_v17 }
  0xf5   :  { %v292_v20 = vpop.f32.mrf.mxu0 }
  0xf6   :  { %310 = vmatmul.mubr.bf16.vlgmr.msra.gmra.mxu1 %v131_v19 }
 0x1b6   :  { %v237_v22 = vpop.f32.mrf.mxu1 }
 0x1b7   :  { %v238_v23 = vadd.f32 %v264_v21, %v237_v22 }
 0x1b8   :  { %v311_v24 = vpop.f32.mrf.mxu1 }
 0x1b9   :  { %243 = vst [vmem:[#allocation8] sm:$0xff] %v238_v23 }
 0x1ba   :  { %v240_v25 = vpop.f32.mrf.mxu1 }
 0x1bb   :  { %402 = shalt.err (!%p399_p5)
}
 0x1bc   :  { %253 = dma.vmem_to_hbm [thread:$0]  %s251_s12, 128, %s478_s5, [#allocation4]   ;;  %v312_v26 = vpop.f32.mrf.mxu1 }
 0x1bd   :  { %415 = dma.done.wait [#allocation4], 128  }
 0x1be   :  { %416 = vsyncadd [#allocation4], 4294967168 }
 0x1bf   :  { %257 = vsyncpa [#allocation3], 1 }
 0x1c0   :  { %258 = vsyncpa [#allocation6], 1 }
 0x1c1   :  { %259 = vsyncpa [#allocation4], 1 }

// kernel: tpu_custom_call.1
= control target key start
LH: loop header
LB: loop body
LE: loop exit
PB: predicated region body
PF: predicated region fallthrough
CT: control target
= control target key end

     0   :  { %10 = vsyncpa [#allocation3], 0  ;;  %s473_s0 = inlined_call_operand.hbm [shape: f32[8,32], index: 0, kind: input, shape index: {}]   ;;  %s474_s1 = inlined_call_operand.hbm [shape: bf16[32,128], index: 1, kind: input, shape index: {}]   ;;  %s475_s2 = inlined_call_operand.vmem [shape: f32[1,128], index: 2, kind: input, shape index: {}]   ;;  %s476_s3 = inlined_call_operand.hbm [shape: bf16[128,128], index: 3, kind: input, shape index: {}]   ;;  %s477_s4 = inlined_call_operand.vmem [shape: f32[1,128], index: 4, kind: input, shape index: {}]   ;;  %s478_s5 = inlined_call_operand.hbm [shape: f32[8,128], index: 5, kind: output, shape index: {}]  }
   0x1   :  { %11 = vsyncpa [#allocation6], 0 }
   0x2   :  { %12 = vsyncpa [#allocation4], 0  ;;  %s417_s18 = smov [#allocation5]  }
   0x3   :  { %s28_s19 = sshll.u32 %s417_s18, 4  ;;  %s29_s19 = int_to_ptr.vmem [resolvable:$true] %s28_s19 }
   0x4   :  { %s339_s20 = scalar_lea.vmem %s29_s19, 256  ;;  %p344_p1 = scmp.lt.s32.totalorder %s29_s19, %s29_s19 }
   0x5   :  { %p340_p0 = scmp.ne.s32.totalorder %s29_s19, %s339_s20  ;;  %p345_p2 = scmp.lt.s32.totalorder %s339_s20, %s339_s20 }
   0x7   :  { %p346_p3 = por %p345_p2, %p344_p1 }
   0x9   :  { %p347_p4 = pnand %p346_p3, %p340_p0 }
   0xb   :  { %350 = shalt.err (!%p347_p4)
}
   0xc   :  { %s418_s21 = smov 64   ;;  %s419_s22 = smov 4  }
   0xd   :  { %34 = dma.hbm_to_vmem [thread:$0]  %s474_s1, 256, %s29_s19, [#allocation6], %s418_s21, %s418_s21, %s419_s22  }
   0xe   :  { %s420_s25 = smov [#allocation2]   ;;  %s421_s27 = smov [#allocation7]  }
   0xf   :  { %s19_s26 = sshll.u32 %s420_s25, 4  ;;  %s42_s28 = sshll.u32 %s421_s27, 4  ;;  %s20_s26 = int_to_ptr.vmem [resolvable:$true] %s19_s26  ;;  %s43_s28 = int_to_ptr.vmem [resolvable:$true] %s42_s28 }
  0x10   :  { %s359_s29 = scalar_lea.vmem %s20_s26, 128  ;;  %p364_p6 = scmp.lt.s32.totalorder %s20_s26, %s20_s26 }
  0x11   :  { %p360_p5 = scmp.ne.s32.totalorder %s20_s26, %s359_s29  ;;  %p365_p7 = scmp.lt.s32.totalorder %s359_s29, %s359_s29 }
  0x13   :  { %p366_p8 = por %p365_p7, %p364_p6 }
  0x15   :  { %p367_p9 = pnand %p366_p8, %p360_p5 }
  0x17   :  { %370 = shalt.err (!%p367_p9)
}
  0x18   :  { %22 = dma.hbm_to_vmem [thread:$0]  %s473_s0, 128, %s20_s26, [#allocation3]  }
  0x19   :  { %s379_s7 = scalar_lea.vmem %s43_s28, 1024  ;;  %p384_p11 = scmp.lt.s32.totalorder %s43_s28, %s43_s28 }
  0x1a   :  { %p380_p10 = scmp.ne.s32.totalorder %s43_s28, %s379_s7  ;;  %p385_p12 = scmp.lt.s32.totalorder %s379_s7, %s379_s7 }
  0x1c   :  { %p386_p13 = por %p385_p12, %p384_p11 }
  0x1e   :  { %p387_p0 = pnand %p386_p13, %p380_p10 }
  0x20   :  { %390 = shalt.err (!%p387_p0)
}
  0x21   :  { %48 = dma.hbm_to_vmem [thread:$0]  %s476_s3, 1024, %s43_s28, [#allocation6], %s418_s21, %s418_s21, %s419_s22  }
  0x22   :  { %411 = dma.done.wait [#allocation3], 128  }
  0x23   :  { %412 = vsyncadd [#allocation3], 4294967168 }
  0x24   :  { %413 = dma.done.wait [#allocation6], 1280  }
  0x25   :  { %414 = vsyncadd [#allocation6], 4294966016  ;;  %v422_v0 = vmov 0.0   ;;  %vm423_vm0 = vmmov 0   ;;  %v321_v1 = vld [vmem:[#allocation5 + $0x8] sm:$0xff]   ;;  %v322_v2 = vld [vmem:[#allocation5] sm:$0xff]  }
  0x26   :  { %285 = vmatprep.subr.bf16.mxu0 %v422_v0  ;;  %289 = vmatprep.mubr.msk.bf16.mxu0 %vm423_vm0, %v422_v0  ;;  %v61_v3 = vld [vmem:[#allocation2] sm:$0xff]  ;;  %v323_v4 = vld [vmem:[#allocation7 + $0x38] sm:$0xff]   ;;  %v324_v6 = vld [vmem:[#allocation7 + $0x30] sm:$0xff]   ;;  %vm86_vm1 = vcmask 261120   ;;  %s424_s11 = smov [#allocation8]  }
  0x27   :  { %293 = vmatprep.subr.bf16.mxu1 %v422_v0  ;;  %309 = vmatprep.mubr.msk.bf16.mxu1 %vm423_vm0, %v422_v0  ;;  %v62_v5 = vpack.c.bf16 %v61_v3, %v61_v3  ;;  %v325_v7 = vld [vmem:[#allocation7 + $0x28] sm:$0xff]   ;;  %v326_v8 = vld [vmem:[#allocation7 + $0x20] sm:$0xff]   ;;  %v327_v9 = vld [vmem:[#allocation7 + $0x18] sm:$0xff]   ;;  %s250_s12 = sshll.u32 %s424_s11, 4  ;;  %s251_s12 = int_to_ptr.vmem [resolvable:$true] %s250_s12 }
  0x28   :  { %286 = vmatpush3.bf16.msra.mxu0 %v321_v1  ;;  %294 = vmatpush3.bf16.msra.mxu1 %v323_v4  ;;  %v328_v10 = vld [vmem:[#allocation7 + $0x10] sm:$0xff]   ;;  %v329_v11 = vld [vmem:[#allocation7 + $0x8] sm:$0xff]   ;;  %v330_v12 = vld [vmem:[#allocation7] sm:$0xff]   ;;  %p396_p2 = scmp.lt.s32.totalorder %s251_s12, %s251_s12 }
  0x29   :  { %287 = vmatprep.subr.bf16.mxu0 %v422_v0  ;;  %295 = vmatprep.subr.bf16.mxu1 %v422_v0  ;;  %v260_v13 = vld [vmem:[%s475_s2] ss:$0 sm:$0xff]  ;;  %s391_s2 = scalar_lea.vmem %s251_s12, 128 }
  0x2a   :  { %v264_v21 = vld [vmem:[%s477_s4] ss:$0 sm:$0xff]  ;;  %p392_p1 = scmp.ne.s32.totalorder %s251_s12, %s391_s2  ;;  %p397_p3 = scmp.lt.s32.totalorder %s391_s2, %s391_s2 }
  0x2c   :  { %288 = vmatpush3.bf16.msra.mxu0 %v322_v2  ;;  %296 = vmatpush3.bf16.msra.mxu1 %v324_v6  ;;  %p398_p4 = por %p397_p3, %p396_p2 }
  0x2d   :  { %297 = vmatprep.subr.bf16.mxu1 %v422_v0 }
  0x2e   :  { %p399_p5 = pnand %p398_p4, %p392_p1 }
  0x2f   :  { %290 = vmatmul.mubr.msk.bf16.vlgmr.msra.gmra.mxu0 %vm86_vm1, %v62_v5 }
  0x30   :  { %298 = vmatpush3.bf16.msra.mxu1 %v325_v7 }
  0x31   :  { %299 = vmatprep.subr.bf16.mxu1 %v422_v0 }
  0x34   :  { %300 = vmatpush3.bf16.msra.mxu1 %v326_v8 }
  0x35   :  { %301 = vmatprep.subr.bf16.mxu1 %v422_v0 }
  0x38   :  { %302 = vmatpush3.bf16.msra.mxu1 %v327_v9 }
  0x39   :  { %303 = vmatprep.subr.bf16.mxu1 %v422_v0 }
  0x3c   :  { %304 = vmatpush3.bf16.msra.mxu1 %v328_v10 }
  0x3d   :  { %305 = vmatprep.subr.bf16.mxu1 %v422_v0 }
  0x40   :  { %306 = vmatpush3.bf16.msra.mxu1 %v329_v11 }
  0x41   :  { %307 = vmatprep.subr.bf16.mxu1 %v422_v0 }
  0x44   :  { %308 = vmatpush3.bf16.msra.mxu1 %v330_v12 }
  0xef   :  { %v124_v14 = vpop.f32.mrf.mxu0 }
  0xf0   :  { %v125_v15 = vadd.f32 %v260_v13, %v124_v14 }
  0xf1   :  { %v291_v16 = vpop.f32.mrf.mxu0 }
  0xf2   :  { %v130_v17 = vmax.f32 %v125_v15, 0.0 }
  0xf3   :  { %v127_v18 = vpop.f32.mrf.mxu0 }
  0xf4   :  { %v131_v19 = vpack.c.bf16 %v130_v17, %v130_v17 }
  0xf5   :  { %v292_v20 = vpop.f32.mrf.mxu0 }
  0xf6   :  { %310 = vmatmul.mubr.bf16.vlgmr.msra.gmra.mxu1 %v131_v19 }
 0x1b6   :  { %v237_v22 = vpop.f32.mrf.mxu1 }
 0x1b7   :  { %v238_v23 = vadd.f32 %v264_v21, %v237_v22 }
 0x1b8   :  { %v311_v24 = vpop.f32.mrf.mxu1 }
 0x1b9   :  { %243 = vst [vmem:[#allocation8] sm:$0xff] %v238_v23 }
 0x1ba   :  { %v240_v25 = vpop.f32.mrf.mxu1 }
 0x1bb   :  { %402 = shalt.err (!%p399_p5)
}
 0x1bc   :  { %253 = dma.vmem_to_hbm [thread:$0]  %s251_s12, 128, %s478_s5, [#allocation4]   ;;  %v312_v26 = vpop.f32.mrf.mxu1 }
 0x1bd   :  { %415 = dma.done.wait [#allocation4], 128  }
 0x1be   :  { %416 = vsyncadd [#allocation4], 4294967168 }
 0x1bf   :  { %257 = vsyncpa [#allocation3], 1 }
 0x1c0   :  { %258 = vsyncpa [#allocation6], 1 }
 0x1c1   :  { %259 = vsyncpa [#allocation4], 1 }

</bundles_post_ra>
